<compile_context>
chip_gen: v7x
topology: tpu7x:2x2x1
jax: 0.10.0
libtpu: 0.0.40
codegen_flags: <defaults>
</compile_context>

<pallas_src>
import jax
import jax.numpy as jnp
from jax.experimental import pallas as pl
from jax.experimental.pallas import tpu as pltpu


def _round_up(x, m):
    return ((x + m - 1) // m) * m


def _mlp_kernel(x_ref, w1_ref, b1_ref, w2_ref, b2_ref, out_ref):
    # One row-tile of nodes per grid step; both GEMMs + ReLU fused on-chip.
    x = x_ref[...]                                                    # (tm, D_in) bf16
    h = jnp.dot(x, w1_ref[...], preferred_element_type=jnp.float32)   # (tm, H)  f32 acc
    h = jnp.maximum(h + b1_ref[...], 0.0)                             # bias + ReLU in f32 (VPU)
    o = jnp.dot(h.astype(w2_ref.dtype), w2_ref[...],
                preferred_element_type=jnp.float32)                   # (tm, C_pad) f32 acc
    out_ref[...] = (o + b2_ref[...]).astype(out_ref.dtype)            # lane-dense full-width store


def _pick_tile_m(n, d_in, c_pad, vmem_budget_bytes=8 << 20):
    """Largest row tile under a conservative VMEM budget (safe on v7x's 32 MiB
    scoped default), multiple of 16 (bf16 sublane packing), and sized so the
    grid has >= 2 steps when possible (v7x has 2 TensorCores)."""
    # Double-buffered bf16 feature stream + double-buffered f32 output stream.
    bytes_per_row = 2 * (d_in * 2) + 2 * (c_pad * 4)
    cap = max(16, (vmem_budget_bytes // bytes_per_row) // 16 * 16)
    cap = min(cap, 1024)
    half = -(-n // 2)                       # ceil(n / 2) -> at least 2 grid steps
    return max(16, min(cap, _round_up(half, 16)))


def net_forward(features, w1, b1, w2, b2, *, tile_m=None):
    """Pallas implementation of NET.forward == base_model(features)."""
    n, d_in = features.shape
    hdim = w1.shape[1]
    c = w2.shape[1]

    # Lane-dense output: pad the class dim to a multiple of 128 so the final
    # store uses full 128-lane vregs; padded lanes are sliced off afterwards.
    c_pad = _round_up(c, 128)

    if tile_m is None:
        tile_m = _pick_tile_m(n, d_in, c_pad)
    tile_m = _round_up(tile_m, 16)

    # Pad the node dim so the cdiv grid covers N exactly (real node counts like
    # CoraFull's ~19.8k don't divide nicely); padded rows sliced off afterwards.
    n_pad = _round_up(max(n, tile_m), tile_m)
    grid = (n_pad // tile_m,)

    # bf16 operands for both MXU dots (halves dominant HBM feature traffic);
    # biases stay f32, accumulation is f32 via preferred_element_type.
    x = features.astype(jnp.bfloat16)
    if n_pad != n:
        x = jnp.pad(x, ((0, n_pad - n), (0, 0)))
    w1b = w1.astype(jnp.bfloat16)
    w2b = jnp.pad(w2, ((0, 0), (0, c_pad - c))).astype(jnp.bfloat16)
    b1f = b1.astype(jnp.float32).reshape(1, hdim)
    b2f = jnp.pad(b2.astype(jnp.float32).reshape(1, c), ((0, 0), (0, c_pad - c)))

    flops = 2 * n_pad * (d_in * hdim + hdim * c_pad)
    bytes_accessed = (n_pad * d_in * 2          # bf16 features
                      + d_in * hdim * 2         # bf16 W1
                      + hdim * 4                # f32 b1
                      + hdim * c_pad * 2        # bf16 W2 (padded)
                      + c_pad * 4               # f32 b2 (padded)
                      + n_pad * c_pad * 4)      # f32 logits (padded)

    out = pl.pallas_call(
        _mlp_kernel,
        out_shape=jax.ShapeDtypeStruct((n_pad, c_pad), jnp.float32),
        grid_spec=pltpu.PrefetchScalarGridSpec(
            num_scalar_prefetch=0,
            grid=grid,
            in_specs=[
                pl.BlockSpec((tile_m, d_in), lambda i: (i, 0)),   # feature row tile
                pl.BlockSpec((d_in, hdim), lambda i: (0, 0)),     # W1 (resident)
                pl.BlockSpec((1, hdim), lambda i: (0, 0)),        # b1 (resident)
                pl.BlockSpec((hdim, c_pad), lambda i: (0, 0)),    # W2 (resident, lane-padded)
                pl.BlockSpec((1, c_pad), lambda i: (0, 0)),       # b2 (resident, lane-padded)
            ],
            out_specs=pl.BlockSpec((tile_m, c_pad), lambda i: (i, 0)),
        ),
        compiler_params=pltpu.CompilerParams(
            dimension_semantics=("parallel",),
        ),
        cost_estimate=pl.CostEstimate(
            flops=flops, transcendentals=0, bytes_accessed=bytes_accessed),
    )(x, w1b, b1f, w2b, b2f)

    return out[:n, :c].astype(features.dtype)


def _reference_forward(features, w1, b1, w2, b2):
    # Same bf16-operand / f32-accumulate recipe as the kernel.
    x = features.astype(jnp.bfloat16)
    h = jnp.dot(x, w1.astype(jnp.bfloat16), preferred_element_type=jnp.float32)
    h = jnp.maximum(h + b1.astype(jnp.float32), 0.0)
    o = jnp.dot(h.astype(jnp.bfloat16), w2.astype(jnp.bfloat16),
                preferred_element_type=jnp.float32)
    return (o + b2.astype(jnp.float32)).astype(features.dtype)


if __name__ == "__main__":
    # Small shapes consistent with a node-classification base model.
    # N intentionally not a multiple of the tile to exercise row padding.
    N, D_IN, HID, C = 200, 64, 32, 16

    key = jax.random.PRNGKey(0)
    k_feat, k_w1, k_w2 = jax.random.split(key, 3)

    features = jax.random.normal(k_feat, (N, D_IN), dtype=jnp.float32)

    # Deterministic parameter init (synthetic; no checkpoint loading).
    w1 = jax.random.normal(k_w1, (D_IN, HID), dtype=jnp.float32) * 0.1
    b1 = jnp.zeros((1, HID), dtype=jnp.float32)
    w2 = jax.random.normal(k_w2, (HID, C), dtype=jnp.float32) * 0.1
    b2 = jnp.zeros((1, C), dtype=jnp.float32)

    out = net_forward(features, w1, b1, w2, b2)
    out = jax.block_until_ready(out)

    ref = _reference_forward(features, w1, b1, w2, b2)
    assert out.shape == (N, C)
    assert jnp.allclose(out, ref, atol=2e-2, rtol=2e-2), "mismatch vs reference"

    print("KERNEL_OK")
</pallas_src>

<mosaic_0001>
module attributes {stable_mosaic.version = 11 : i64} {
  func.func @_mlp_kernel(%arg0: i32, %arg1: memref<112x64xbf16, #tpu.memory_space<vmem>>, %arg2: memref<64x32xbf16, #tpu.memory_space<vmem>>, %arg3: memref<1x32xf32, #tpu.memory_space<vmem>>, %arg4: memref<32x128xbf16, #tpu.memory_space<vmem>>, %arg5: memref<1x128xf32, #tpu.memory_space<vmem>>, %arg6: memref<112x128xf32, #tpu.memory_space<vmem>>) attributes {dimension_semantics = [#tpu.dimension_semantics<parallel>], iteration_bounds = array<i64: 2>, scalar_prefetch = 0 : i64, scratch_operands = 0 : i64, tpu.core_type = #tpu.core_type<tc>, window_params = [{transform_indices = @transform_0, window_bounds = array<i64: 112, 64>}, {pipeline_mode = #tpu.pipeline_mode<synchronous>, transform_indices = @transform_1, window_bounds = array<i64: 64, 32>}, {pipeline_mode = #tpu.pipeline_mode<synchronous>, transform_indices = @transform_2, window_bounds = array<i64: 1, 32>}, {pipeline_mode = #tpu.pipeline_mode<synchronous>, transform_indices = @transform_3, window_bounds = array<i64: 32, 128>}, {pipeline_mode = #tpu.pipeline_mode<synchronous>, transform_indices = @transform_4, window_bounds = array<i64: 1, 128>}, {transform_indices = @transform_5, window_bounds = array<i64: 112, 128>}]} {
    %c0 = arith.constant 0 : index
    %c0_0 = arith.constant 0 : index
    %0 = vector.load %arg1[%c0, %c0_0] : memref<112x64xbf16, #tpu.memory_space<vmem>>, vector<112x64xbf16>
    %c0_1 = arith.constant 0 : index
    %c0_2 = arith.constant 0 : index
    %1 = vector.load %arg2[%c0_1, %c0_2] : memref<64x32xbf16, #tpu.memory_space<vmem>>, vector<64x32xbf16>
    %cst = arith.constant dense<0.000000e+00> : vector<112x32xf32>
    %2 = tpu.matmul %0, %1, %cst {dimension_numbers = #tpu.dot_dimension_numbers<[1], [0], [0], [1], [0, 0, 1, 1], [], []>} : vector<112x64xbf16>, vector<64x32xbf16>, vector<112x32xf32> -> vector<112x32xf32>
    %c0_3 = arith.constant 0 : index
    %c0_4 = arith.constant 0 : index
    %3 = vector.load %arg3[%c0_3, %c0_4] : memref<1x32xf32, #tpu.memory_space<vmem>>, vector<1x32xf32>
    %4 = vector.broadcast %3 : vector<1x32xf32> to vector<112x32xf32>
    %5 = arith.addf %2, %4 : vector<112x32xf32>
    %cst_5 = arith.constant 0.000000e+00 : f32
    %6 = vector.broadcast %cst_5 : f32 to vector<112x32xf32>
    %7 = arith.maximumf %5, %6 : vector<112x32xf32>
    %8 = arith.truncf %7 : vector<112x32xf32> to vector<112x32xbf16>
    %c0_6 = arith.constant 0 : index
    %c0_7 = arith.constant 0 : index
    %9 = vector.load %arg4[%c0_6, %c0_7] : memref<32x128xbf16, #tpu.memory_space<vmem>>, vector<32x128xbf16>
    %cst_8 = arith.constant dense<0.000000e+00> : vector<112x128xf32>
    %10 = tpu.matmul %8, %9, %cst_8 {dimension_numbers = #tpu.dot_dimension_numbers<[1], [0], [0], [1], [0, 0, 1, 1], [], []>} : vector<112x32xbf16>, vector<32x128xbf16>, vector<112x128xf32> -> vector<112x128xf32>
    %c0_9 = arith.constant 0 : index
    %c0_10 = arith.constant 0 : index
    %11 = vector.load %arg5[%c0_9, %c0_10] : memref<1x128xf32, #tpu.memory_space<vmem>>, vector<1x128xf32>
    %12 = vector.broadcast %11 : vector<1x128xf32> to vector<112x128xf32>
    %13 = arith.addf %10, %12 : vector<112x128xf32>
    %c0_11 = arith.constant 0 : index
    %c0_12 = arith.constant 0 : index
    %14 = vector.load %arg6[%c0_11, %c0_12] : memref<112x128xf32, #tpu.memory_space<vmem>>, vector<112x128xf32>
    tpu.vector_store %arg6[%c0_11, %c0_12], %13 {strides = array<i32>} : memref<112x128xf32, #tpu.memory_space<vmem>>, vector<112x128xf32>,
    return
  }
  func.func @transform_0(%arg0: i32) -> (i32, i32) {
    %c0_i32 = arith.constant 0 : i32
    %c0_i32_0 = arith.constant 0 : i32
    return %arg0, %c0_i32 : i32, i32
  }
  func.func @transform_1(%arg0: i32) -> (i32, i32) {
    %c0_i32 = arith.constant 0 : i32
    %c0_i32_0 = arith.constant 0 : i32
    %c0_i32_1 = arith.constant 0 : i32
    return %c0_i32, %c0_i32_0 : i32, i32
  }
  func.func @transform_2(%arg0: i32) -> (i32, i32) {
    %c0_i32 = arith.constant 0 : i32
    %c0_i32_0 = arith.constant 0 : i32
    %c0_i32_1 = arith.constant 0 : i32
    return %c0_i32, %c0_i32_0 : i32, i32
  }
  func.func @transform_3(%arg0: i32) -> (i32, i32) {
    %c0_i32 = arith.constant 0 : i32
    %c0_i32_0 = arith.constant 0 : i32
    %c0_i32_1 = arith.constant 0 : i32
    return %c0_i32, %c0_i32_0 : i32, i32
  }
  func.func @transform_4(%arg0: i32) -> (i32, i32) {
    %c0_i32 = arith.constant 0 : i32
    %c0_i32_0 = arith.constant 0 : i32
    %c0_i32_1 = arith.constant 0 : i32
    return %c0_i32, %c0_i32_0 : i32, i32
  }
  func.func @transform_5(%arg0: i32) -> (i32, i32) {
    %c0_i32 = arith.constant 0 : i32
    %c0_i32_0 = arith.constant 0 : i32
    return %arg0, %c0_i32 : i32, i32
  }
}

</mosaic_0001>

<bundles_post_ra>
// kernel: tpu_custom_call.1
= control target key start
LH: loop header
LB: loop body
LE: loop exit
PB: predicated region body
PF: predicated region fallthrough
CT: control target
= control target key end

     0   :  { %10 = vsyncpa [#allocation3], 0  ;;  %s1164_s0 = inlined_call_operand.vmem [shape: bf16[224,64], index: 0, kind: input, shape index: {}]   ;;  %s1165_s1 = inlined_call_operand.vmem [shape: bf16[64,32], index: 1, kind: input, shape index: {}]   ;;  %s1166_s2 = inlined_call_operand.vmem [shape: f32[1,32], index: 2, kind: input, shape index: {}]   ;;  %s1167_s3 = inlined_call_operand.vmem [shape: bf16[32,128], index: 3, kind: input, shape index: {}]   ;;  %s1168_s4 = inlined_call_operand.vmem [shape: f32[1,128], index: 4, kind: input, shape index: {}]   ;;  %s1169_s5 = inlined_call_operand.hbm [shape: f32[224,128], index: 5, kind: output, shape index: {}]  }
   0x1   :  { %12 = vsyncpa [#allocation3 + $0x1], 0  ;;  %s953_s18 = smov 0   ;;  %s955_s19 = smov 0  }
   0x2   :  { %s957_s20 = smov 0   ;;  %s959_s21 = smov 0  }
   0x3 LB: > { %s974_s22 = sadd.s32 4294967295, %s916_s21   ;;  %s671_s23 = sadd.s32 4294967294, %s916_s21   ;;  %s916_s21 = sphi %s959_s21, %s1175_s21   ;;  %s912_s20 = sphi %s957_s20, %s1174_s20   ;;  %s908_s19 = sphi %s955_s19, %s1173_s19   ;;  %s904_s18 = sphi %s953_s18, %s1172_s18  }
   0x4   : > { %s978_s24 = sadd.s32 1, %s916_s21   ;;  %s135_s25 = sadd.s32 1, %s912_s20 }
   0x5   : > { %s132_s26 = ssub.s32 %s916_s21, %s978_s24  ;;  %p145_p0 = scmp.ne.s32.totalorder %s912_s20, %s908_s19 }
   0x6   : > { %p133_p1 = scmp.eq.s32.totalorder %s132_s26, 0  ;;  %p146_p2 = scmp.eq.s32.totalorder %s974_s22, 1 }
   0x7   : > { %p151_p3 = scmp.ne.s32.totalorder %s908_s19, %s904_s18  ;;  %p152_p4 = scmp.eq.s32.totalorder %s671_s23, 1 }
   0x8   : > { %s989_s27 = scalar_select %p133_p1, %s912_s20, %s135_s25  }
   0x9   : > { %p991_p5 = por %p146_p2, %p145_p0  ;;  %p995_p6 = por %p152_p4, %p151_p3 }
   0xa   : > { %p674_p7 = scmp.ge.s32.totalorder %s916_s21, 1  ;;  %p191_p8 = scmp.lt.s32.totalorder %s916_s21, 3 }
   0xc   : > { %p192_p9 = pnand %p674_p7, %p191_p8 }
   0xd   : > { %v841_v0 = vld [vmem:[%s1165_s1] sm:$0xff] (!%p192_p9)   ;;  %v918_v1 = vmov (!%p192_p9), 0.0   ;;  %v842_v2 = vld [vmem:[%s1165_s1 + $0x8] sm:$0xff] (!%p192_p9)   ;;  %vm919_vm0 = vmmov (!%p192_p9), 0   ;;  %s219_s9 = smul.u32 (!%p192_p9), 14, %s974_s22  ;;  %v843_v3 = vld [vmem:[%s1165_s1 + $0x10] sm:$0xff] (!%p192_p9)  }
   0xe   : > { %195 = sbr.rel (%p192_p9) target bundleno = 529 (0x211), region = 40  ;;  %729 = vmatprep.subr.bf16.mxu0 (!%p192_p9), %v918_v1  ;;  %765 = vmatprep.subr.bf16.mxu1 (!%p192_p9), %v918_v1  ;;  %v844_v4 = vld [vmem:[%s1165_s1 + $0x18] sm:$0xff] (!%p192_p9)   ;;  %vm315_vm1 = vcmask (!%p192_p9), 523264   ;;  %v852_v12 = vld [vmem:[%s1167_s3] sm:$0xff] (!%p192_p9)   ;;  %v853_v13 = vld [vmem:[%s1167_s3 + $0x8] sm:$0xff] (!%p192_p9)   ;;  %vm470_vm2 = vcmask (!%p192_p9), 261120  }
   0xf   : > { %730 = vmatpush3.bf16.msra.mxu0 (!%p192_p9), %v841_v0  ;;  %737 = vmatprep.mubr.msk.bf16.mxu0 (!%p192_p9), %vm919_vm0, %v918_v1  ;;  %p220_p10 = scmp.lt.s32.totalorder (!%p192_p9), %s219_s9, 27  ;;  %v1055_v14 = vld [vmem:[%s1166_s2] ss:$0 sm:$0xff] (!%p192_p9)  ;;  %s216_s8 = sand.u32 (!%p192_p9), 1, %s908_s19  }
  0x10   : > { %731 = vmatprep.subr.bf16.mxu0 (!%p192_p9), %v918_v1  ;;  %769 = vmatprep.mubr.msk.bf16.mxu1 (!%p192_p9), %vm919_vm0, %v918_v1  ;;  %s708_s13 = smul.u32 (!%p192_p9), 1792, %s974_s22  ;;  %s1123_s22 = scalar_lea.sflag (!%p192_p9), [#allocation3], %s216_s8 }
  0x11   : > { %766 = vmatpush3.bf16.msra.mxu1 (!%p192_p9), %v852_v12  ;;  %s920_s25 = smov (!%p192_p9), [#allocation2]  }
  0x12   : > { %767 = vmatprep.subr.bf16.mxu1 (!%p192_p9), %v918_v1  ;;  %s1115_s17 = scalar_lea.hbm (!%p192_p9), %s1169_s5, %s708_s13  ;;  %s858_s26 = sshll.u32 (!%p192_p9), %s920_s25, 4  ;;  %s859_s26 = int_to_ptr.vmem [resolvable:$false] %s858_s26 }
  0x13   : > { %732 = vmatpush3.bf16.msra.mxu0 (!%p192_p9), %v842_v2  ;;  %s860_s30 = scalar_lea.vmem (!%p192_p9), %s859_s26, 3584 }
  0x14   : > { %733 = vmatprep.subr.bf16.mxu0 (!%p192_p9), %v918_v1 }
  0x15   : > { %s1177_s9 = smov (!%p220_p10, %s219_s9), 27  ;;  %768 = vmatpush3.bf16.msra.mxu1 %v853_v13 }
  0x16   : > { %s675_s12 = sshll.u32 %s1177_s9, 2  ;;  %s797_s9 = smul.u32 112, %s216_s8 }
  0x17   : > { %s223_s15 = scalar_lea.vmem %s1164_s0, %s675_s12  ;;  %734 = vmatpush3.bf16.msra.mxu0 %v843_v3 }
  0x18   : > { %735 = vmatprep.subr.bf16.mxu0 %v918_v1  ;;  %v845_v5 = vld [vmem:[%s223_s15] sm:$0xff]   ;;  %v846_v6 = vld [vmem:[%s223_s15 + $0x8] sm:$0xff]   ;;  %v847_v7 = vld [vmem:[%s223_s15 + $0x10] sm:$0xff]   ;;  %s1096_s12 = scalar_lea.vmem [#allocation2], %s797_s9 }
  0x19   : > { %v848_v8 = vld [vmem:[%s223_s15 + $0x18] sm:$0xff]   ;;  %v849_v9 = vld [vmem:[%s223_s15 + $0x20] sm:$0xff]   ;;  %v850_v10 = vld [vmem:[%s223_s15 + $0x28] sm:$0xff]   ;;  %s609_s14 = sshll.u32 %s1096_s12, 4  ;;  %s1117_s14 = int_to_ptr.vmem [resolvable:$true] %s609_s14 }
  0x1a   : > { %v851_v11 = vld [vmem:[%s223_s15 + $0x30] sm:$0xff]   ;;  %s854_s23 = scalar_lea.vmem %s1117_s14, 1792  ;;  %p861_p0 = scmp.lt.s32.totalorder %s1117_s14, %s859_s26 }
  0x1b   : > { %736 = vmatpush3.bf16.msra.mxu0 %v844_v4  ;;  %p855_p11 = scmp.ne.s32.totalorder %s1117_s14, %s854_s23  ;;  %p862_p1 = scmp.lt.s32.totalorder %s860_s30, %s854_s23 }
  0x1d   : > { %p856_p12 = pnand %p855_p11, %p991_p5  ;;  %p863_p2 = por %p862_p1, %p861_p0 }
  0x1e   : > { %738 = vmatmul.mubr.msk.bf16.vlgmr.msra.gmra.mrb[0].mxu0 %vm315_vm1, %v845_v5 }
  0x1f   : > { %741 = vmatprep.mubr.msk.bf16.mxu0 %vm919_vm0, %v918_v1  ;;  %p857_p13 = pneg %p856_p12 }
  0x21   : > { %p864_p3 = pnand %p863_p2, %p857_p13 }
  0x26   : > { %742 = vmatmul.mubr.msk.bf16.gmra.mrb[4].mxu0 %vm315_vm1, %v846_v6 }
  0x27   : > { %745 = vmatprep.mubr.msk.bf16.mxu0 %vm919_vm0, %v918_v1 }
  0x2e   : > { %746 = vmatmul.mubr.msk.bf16.gmra.mrb[8].mxu0 %vm315_vm1, %v847_v7 }
  0x2f   : > { %749 = vmatprep.mubr.msk.bf16.mxu0 %vm919_vm0, %v918_v1 }
  0x36   : > { %750 = vmatmul.mubr.msk.bf16.gmra.mrb[12].mxu0 %vm315_vm1, %v848_v8 }
  0x37   : > { %753 = vmatprep.mubr.msk.bf16.mxu0 %vm919_vm0, %v918_v1 }
  0x3e   : > { %754 = vmatmul.mubr.msk.bf16.gmra.mrb[16].mxu0 %vm315_vm1, %v849_v9 }
  0x3f   : > { %757 = vmatprep.mubr.msk.bf16.mxu0 %vm919_vm0, %v918_v1 }
  0x46   : > { %758 = vmatmul.mubr.msk.bf16.gmra.mrb[20].mxu0 %vm315_vm1, %v850_v10 }
  0x47   : > { %761 = vmatprep.mubr.msk.bf16.mxu0 %vm919_vm0, %v918_v1 }
  0x4e   : > { %762 = vmatmul.mubr.msk.bf16.gmra.mrb[24].mxu0 %vm315_vm1, %v851_v11 }
  0xf1   : > { %v371_v15 = vpop.f32.mrb[0].mxu0 }
  0xf2   : > { %v372_v16 = vadd.f32 %v1055_v14, %v371_v15  ;;  %v739_v17 = vpop.f32.mrb[1].mxu0 }
  0xf3   : > { %v374_v18 = vpop.f32.mrb[2].mxu0 }
  0xf4   : > { %v375_v19 = vadd.f32 %v1055_v14, %v374_v18  ;;  %v740_v20 = vpop.f32.mrb[3].mxu0  ;;  %v426_v21 = vmax.f32 %v372_v16, 0.0  ;;  %v695_v16 = vld [vmem:[%s1168_s4] ss:$0 sm:$0xff] }
  0xf6   : > { %v427_v22 = vmax.f32 %v375_v19, 0.0 }
  0xf8   : > { %v440_v23 = vpack.c.bf16 %v427_v22, %v426_v21 }
  0xf9   : > { %v379_v24 = vpop.f32.mrb[4].mxu0 }
  0xfa   : > { %v380_v25 = vadd.f32 %v1055_v14, %v379_v24  ;;  %v743_v26 = vpop.f32.mrb[5].mxu0  ;;  %770 = vmatmul.mubr.msk.bf16.vlgmr.msra.gmra.mrb[0].mxu1 %vm470_vm2, %v440_v23 }
  0xfb   : > { %v382_v27 = vpop.f32.mrb[6].mxu0  ;;  %773 = vmatprep.mubr.msk.bf16.mxu1 %vm919_vm0, %v918_v1 }
  0xfc   : > { %v383_v28 = vadd.f32 %v1055_v14, %v382_v27  ;;  %v744_v29 = vpop.f32.mrb[7].mxu0  ;;  %v428_v30 = vmax.f32 %v380_v25, 0.0 }
  0xfe   : > { %v429_v31 = vmax.f32 %v383_v28, 0.0 }
 0x100   : > { %v441_v32 = vpack.c.bf16 %v429_v31, %v428_v30 }
 0x101   : > { %v387_v33 = vpop.f32.mrb[8].mxu0 }
 0x102   : > { %v388_v34 = vadd.f32 %v1055_v14, %v387_v33  ;;  %v747_v35 = vpop.f32.mrb[9].mxu0  ;;  %774 = vmatmul.mubr.msk.bf16.gmra.mrb[4].mxu1 %vm470_vm2, %v441_v32 }
 0x103   : > { %v390_v36 = vpop.f32.mrb[10].mxu0  ;;  %777 = vmatprep.mubr.msk.bf16.mxu1 %vm919_vm0, %v918_v1 }
 0x104   : > { %v391_v37 = vadd.f32 %v1055_v14, %v390_v36  ;;  %v748_v38 = vpop.f32.mrb[11].mxu0  ;;  %v430_v39 = vmax.f32 %v388_v34, 0.0 }
 0x106   : > { %v431_v40 = vmax.f32 %v391_v37, 0.0 }
 0x108   : > { %v442_v41 = vpack.c.bf16 %v431_v40, %v430_v39 }
 0x109   : > { %v395_v42 = vpop.f32.mrb[12].mxu0 }
 0x10a   : > { %v396_v43 = vadd.f32 %v1055_v14, %v395_v42  ;;  %v751_v44 = vpop.f32.mrb[13].mxu0  ;;  %778 = vmatmul.mubr.msk.bf16.gmra.mrb[8].mxu1 %vm470_vm2, %v442_v41 }
 0x10b   : > { %v398_v45 = vpop.f32.mrb[14].mxu0  ;;  %781 = vmatprep.mubr.msk.bf16.mxu1 %vm919_vm0, %v918_v1 }
 0x10c   : > { %v399_v46 = vadd.f32 %v1055_v14, %v398_v45  ;;  %v752_v47 = vpop.f32.mrb[15].mxu0  ;;  %v432_v48 = vmax.f32 %v396_v43, 0.0 }
 0x10e   : > { %v433_v49 = vmax.f32 %v399_v46, 0.0 }
 0x110   : > { %v443_v50 = vpack.c.bf16 %v433_v49, %v432_v48 }
 0x111   : > { %v403_v51 = vpop.f32.mrb[16].mxu0 }
 0x112   : > { %v404_v52 = vadd.f32 %v1055_v14, %v403_v51  ;;  %v755_v53 = vpop.f32.mrb[17].mxu0  ;;  %782 = vmatmul.mubr.msk.bf16.gmra.mrb[12].mxu1 %vm470_vm2, %v443_v50 }
 0x113   : > { %v406_v54 = vpop.f32.mrb[18].mxu0  ;;  %785 = vmatprep.mubr.msk.bf16.mxu1 %vm919_vm0, %v918_v1 }
 0x114   : > { %v407_v55 = vadd.f32 %v1055_v14, %v406_v54  ;;  %v756_v56 = vpop.f32.mrb[19].mxu0  ;;  %v434_v57 = vmax.f32 %v404_v52, 0.0 }
 0x116   : > { %v435_v58 = vmax.f32 %v407_v55, 0.0 }
 0x118   : > { %v444_v59 = vpack.c.bf16 %v435_v58, %v434_v57 }
 0x119   : > { %v411_v60 = vpop.f32.mrb[20].mxu0 }
 0x11a   : > { %v412_v61 = vadd.f32 %v1055_v14, %v411_v60  ;;  %v759_v62 = vpop.f32.mrb[21].mxu0  ;;  %786 = vmatmul.mubr.msk.bf16.gmra.mrb[16].mxu1 %vm470_vm2, %v444_v59 }
 0x11b   : > { %v414_v63 = vpop.f32.mrb[22].mxu0  ;;  %789 = vmatprep.mubr.msk.bf16.mxu1 %vm919_vm0, %v918_v1 }
 0x11c   : > { %v415_v0 = vadd.f32 %v1055_v14, %v414_v63  ;;  %v760_v2 = vpop.f32.mrb[23].mxu0  ;;  %v436_v3 = vmax.f32 %v412_v61, 0.0 }
 0x11e   : > { %v437_v4 = vmax.f32 %v415_v0, 0.0 }
 0x120   : > { %v445_v5 = vpack.c.bf16 %v437_v4, %v436_v3 }
 0x121   : > { %v419_v6 = vpop.f32.mrb[24].mxu0 }
 0x122   : > { %v420_v7 = vadd.f32 %v1055_v14, %v419_v6  ;;  %v763_v8 = vpop.f32.mrb[25].mxu0  ;;  %790 = vmatmul.mubr.msk.bf16.gmra.mrb[20].mxu1 %vm470_vm2, %v445_v5 }
 0x123   : > { %v422_v9 = vpop.f32.mrb[26].mxu0  ;;  %793 = vmatprep.mubr.msk.bf16.mxu1 %vm919_vm0, %v918_v1 }
 0x124   : > { %v423_v10 = vadd.f32 %v1055_v14, %v422_v9  ;;  %v764_v11 = vpop.f32.mrb[27].mxu0  ;;  %v438_v12 = vmax.f32 %v420_v7, 0.0 }
 0x126   : > { %v439_v13 = vmax.f32 %v423_v10, 0.0 }
 0x128   : > { %v446_v15 = vpack.c.bf16 %v439_v13, %v438_v12 }
 0x12a   : > { %794 = vmatmul.mubr.msk.bf16.gmra.mrb[24].mxu1 %vm470_vm2, %v446_v15 }
 0x1cd   : > { %v526_v17 = vpop.f32.mrb[0].mxu1 }
 0x1ce   : > { %v527_v18 = vadd.f32 %v695_v16, %v526_v17  ;;  %v771_v19 = vpop.f32.mrb[1].mxu1 }
 0x1cf   : > { %v529_v20 = vpop.f32.mrb[2].mxu1 }
 0x1d0   : > { %581 = vst [vmem:[%s1096_s12] sm:$0xff] %v527_v18  ;;  %v530_v1 = vadd.f32 %v695_v16, %v529_v20  ;;  %v772_v14 = vpop.f32.mrb[3].mxu1 }
 0x1d2   : > { %582 = vst [vmem:[%s1096_s12 + $0x8] sm:$0xff] %v530_v1 }
 0x1d5   : > { %v534_v21 = vpop.f32.mrb[4].mxu1 }
 0x1d6   : > { %v535_v22 = vadd.f32 %v695_v16, %v534_v21  ;;  %v775_v23 = vpop.f32.mrb[5].mxu1 }
 0x1d7   : > { %v537_v24 = vpop.f32.mrb[6].mxu1 }
 0x1d8   : > { %583 = vst [vmem:[%s1096_s12 + $0x10] sm:$0xff] %v535_v22  ;;  %v538_v25 = vadd.f32 %v695_v16, %v537_v24  ;;  %v776_v26 = vpop.f32.mrb[7].mxu1 }
 0x1da   : > { %584 = vst [vmem:[%s1096_s12 + $0x18] sm:$0xff] %v538_v25 }
 0x1dd   : > { %v542_v27 = vpop.f32.mrb[8].mxu1 }
 0x1de   : > { %v543_v28 = vadd.f32 %v695_v16, %v542_v27  ;;  %v779_v29 = vpop.f32.mrb[9].mxu1 }
 0x1df   : > { %v545_v30 = vpop.f32.mrb[10].mxu1 }
 0x1e0   : > { %585 = vst [vmem:[%s1096_s12 + $0x20] sm:$0xff] %v543_v28  ;;  %v546_v31 = vadd.f32 %v695_v16, %v545_v30  ;;  %v780_v32 = vpop.f32.mrb[11].mxu1 }
 0x1e2   : > { %586 = vst [vmem:[%s1096_s12 + $0x28] sm:$0xff] %v546_v31 }
 0x1e5   : > { %v550_v33 = vpop.f32.mrb[12].mxu1 }
 0x1e6   : > { %v551_v34 = vadd.f32 %v695_v16, %v550_v33  ;;  %v783_v35 = vpop.f32.mrb[13].mxu1 }
 0x1e7   : > { %v553_v36 = vpop.f32.mrb[14].mxu1 }
 0x1e8   : > { %587 = vst [vmem:[%s1096_s12 + $0x30] sm:$0xff] %v551_v34  ;;  %v554_v37 = vadd.f32 %v695_v16, %v553_v36  ;;  %v784_v38 = vpop.f32.mrb[15].mxu1 }
 0x1ea   : > { %588 = vst [vmem:[%s1096_s12 + $0x38] sm:$0xff] %v554_v37 }
 0x1ed   : > { %v558_v39 = vpop.f32.mrb[16].mxu1 }
 0x1ee   : > { %v559_v40 = vadd.f32 %v695_v16, %v558_v39  ;;  %v787_v41 = vpop.f32.mrb[17].mxu1 }
 0x1ef   : > { %v561_v42 = vpop.f32.mrb[18].mxu1 }
 0x1f0   : > { %589 = vst [vmem:[%s1096_s12 + $0x40] sm:$0xff] %v559_v40  ;;  %v562_v43 = vadd.f32 %v695_v16, %v561_v42  ;;  %v788_v44 = vpop.f32.mrb[19].mxu1 }
 0x1f2   : > { %590 = vst [vmem:[%s1096_s12 + $0x48] sm:$0xff] %v562_v43 }
 0x1f5   : > { %v566_v45 = vpop.f32.mrb[20].mxu1 }
 0x1f6   : > { %v567_v46 = vadd.f32 %v695_v16, %v566_v45  ;;  %v791_v47 = vpop.f32.mrb[21].mxu1 }
 0x1f7   : > { %v569_v48 = vpop.f32.mrb[22].mxu1 }
 0x1f8   : > { %591 = vst [vmem:[%s1096_s12 + $0x50] sm:$0xff] %v567_v46  ;;  %v570_v49 = vadd.f32 %v695_v16, %v569_v48  ;;  %v792_v50 = vpop.f32.mrb[23].mxu1 }
 0x1fa   : > { %592 = vst [vmem:[%s1096_s12 + $0x58] sm:$0xff] %v570_v49 }
 0x1fd   : > { %v574_v51 = vpop.f32.mrb[24].mxu1 }
 0x1fe   : > { %v575_v52 = vadd.f32 %v695_v16, %v574_v51  ;;  %v795_v53 = vpop.f32.mrb[25].mxu1 }
 0x1ff   : > { %v577_v54 = vpop.f32.mrb[26].mxu1 }
 0x200   : > { %593 = vst [vmem:[%s1096_s12 + $0x60] sm:$0xff] %v575_v52  ;;  %v578_v55 = vadd.f32 %v695_v16, %v577_v54  ;;  %v796_v56 = vpop.f32.mrb[27].mxu1 }
 0x202   : > { %594 = vst [vmem:[%s1096_s12 + $0x68] sm:$0xff] %v578_v55 }
 0x203   : > { %867 = shalt.err (!%p864_p3)
}
 0x204   : > { %s868_s6 = scalar_lea.hbm %s1115_s17, 1792  ;;  %s872_s9 = scalar_lea.hbm %s1169_s5, 3584 }
 0x205   : > { %p869_p4 = scmp.ne.s32.totalorder %s1115_s17, %s868_s6  ;;  %p873_p9 = scmp.lt.u32.totalorder %s1115_s17, %s1169_s5 }
 0x206   : > { %p874_p10 = scmp.lt.u32.totalorder %s872_s9, %s868_s6  ;;  %p876_p12 = scmp.lt.u32.totalorder %s868_s6, %s1115_s17 }
 0x207   : > { %p870_p7 = pnand %p869_p4, %p991_p5 }
 0x208   : > { %p875_p11 = por %p874_p10, %p873_p9 }
 0x209   : > { %p871_p8 = pneg %p870_p7 }
 0x20a   : > { %p877_p13 = por %p876_p12, %p875_p11 }
 0x20c   : > { %p878_p0 = pnand %p877_p13, %p871_p8 }
 0x20e   : > { %881 = shalt.err (!%p878_p0)
}
 0x20f   : > { %s921_s12 = smov 128   ;;  %s922_s13 = smov 8  }
 0x210   : > { %798 = dma.vmem_to_hbm [thread:$0]  (%p991_p5), %s1117_s14, 1792, %s1115_s17, %s1123_s22, %s921_s12, %s921_s12, %s922_s13  }
 0x211 PF: > { %p804_p1 = scmp.ge.s32.totalorder %s916_s21, 2  ;;  %s624_s15 = sand.u32 1, %s904_s18  }
 0x212   : > { %s625_s16 = scalar_lea.sflag [#allocation3], %s624_s15 }
 0x213   : > { %p801_p2 = pnand %p804_p1, %p995_p6 }
 0x215   : > { %899 = dma.done.wait (!%p801_p2), %s625_s16, 1792  }
 0x216   : > { %901 = vsyncadd (!%p801_p2), %s625_s16, 4294965504  ;;  %p15_p3 = scmp.ge.s32.totalorder %s978_s24, 4   ;;  %s1172_s18 = smov %s908_s19 }
 0x217   : > { %s1173_s19 = smov %s912_s20  ;;  %s1174_s20 = smov %s989_s27 }
 0x218   : > { %s1175_s21 = smov %s978_s24  ;;  %17 = sbr.rel (!%p15_p3) target bundleno = 3 (0x3), region = 75 }
 0x21f   :  { %630 = vsyncpa [#allocation3], 1 }
 0x220   :  { %632 = vsyncpa [#allocation3 + $0x1], 1 }

</bundles_post_ra>
